<compile_context>
chip_gen: v5e
topology: v5e:2x2
jax: 0.10.0
libtpu: 0.0.40
codegen_flags: <defaults>
</compile_context>

<pallas_src>
import jax
import jax.numpy as jnp
from jax.experimental import pallas as pl
from jax.experimental.pallas import tpu as pltpu

input_dim = 4
hidden_dim = 64
output_dim = 4


def _round_up(n, m):
    return ((n + m - 1) // m) * m


def mlp_kernel(x_ref, w1_ref, b1_ref, w2_ref, b2_ref, w3_ref, b3_ref, o_ref):
    # Feature-major: x is (input_dim, Bm), weights are PyTorch-layout (out, in),
    # biases are (out, 1).
    x = x_ref[...]                       # (4, Bm)
    w1 = w1_ref[...]                     # (64, 4)

    # fc1: K=4 -> VPU (4 broadcast multiply-adds), frees the MXU for fc2.
    h1 = w1[:, 0:1] * x[0:1, :]
    for k in range(1, input_dim):
        h1 = h1 + w1[:, k:k + 1] * x[k:k + 1, :]
    h1 = jnp.maximum(h1 + b1_ref[...], 0.0)            # (64, Bm)

    # fc2: (64, 64) @ (64, Bm) on the MXU, f32 accumulation.
    h2 = jnp.dot(w2_ref[...], h1, preferred_element_type=jnp.float32)
    h2 = jnp.maximum(h2 + b2_ref[...], 0.0)             # (64, Bm)

    # fc3: (4, 64) @ (64, Bm); output stays lane-dense (N = Bm).
    out = jnp.dot(w3_ref[...], h2, preferred_element_type=jnp.float32)
    o_ref[...] = (out + b3_ref[...]).astype(o_ref.dtype)


def quaternion_nn_forward(x, params, *, block_b=512):
    """x: (B, input_dim) float32.

    params: dict with w1 (64,4), b1 (64,1), w2 (64,64), b2 (64,1),
            w3 (4,64), b3 (4,1)  -- PyTorch nn.Linear weight layout (out, in).
    Returns (B, output_dim) float32.
    """
    B = x.shape[0]
    w1, b1 = params["w1"], params["b1"]
    w2, b2 = params["w2"], params["b2"]
    w3, b3 = params["w3"], params["b3"]

    # Feature-major: batch on the lane axis; pad batch to a tile multiple.
    xT = x.T                                             # (input_dim, B)
    Bm = min(block_b, _round_up(B, 128))
    Bp = _round_up(B, Bm)
    if Bp != B:
        xT = jnp.pad(xT, ((0, 0), (0, Bp - B)))

    grid = (Bp // Bm,)
    resident = lambda arr: pl.BlockSpec(arr.shape, lambda i: (0, 0))

    outT = pl.pallas_call(
        mlp_kernel,
        out_shape=jax.ShapeDtypeStruct((output_dim, Bp), jnp.float32),
        grid=grid,
        in_specs=[
            pl.BlockSpec((input_dim, Bm), lambda i: (0, i)),   # x tile
            resident(w1), resident(b1),
            resident(w2), resident(b2),
            resident(w3), resident(b3),
        ],
        out_specs=pl.BlockSpec((output_dim, Bm), lambda i: (0, i)),
        compiler_params=pltpu.CompilerParams(
            dimension_semantics=("parallel",)),
    )(xT, w1, b1, w2, b2, w3, b3)

    return outT[:, :B].T


def init_params(key):
    """Deterministic init mimicking nn.Linear (weights stored (out, in))."""
    keys = jax.random.split(key, 6)

    def linear(kw, kb, fan_in, fan_out):
        bound = 1.0 / jnp.sqrt(jnp.float32(fan_in))
        w = jax.random.uniform(kw, (fan_out, fan_in), jnp.float32, -bound, bound)
        b = jax.random.uniform(kb, (fan_out,), jnp.float32, -bound, bound)
        return w, b.reshape(fan_out, 1)

    w1, b1 = linear(keys[0], keys[1], input_dim, hidden_dim)
    w2, b2 = linear(keys[2], keys[3], hidden_dim, hidden_dim)
    w3, b3 = linear(keys[4], keys[5], hidden_dim, output_dim)
    return {"w1": w1, "b1": b1, "w2": w2, "b2": b2, "w3": w3, "b3": b3}


def _reference(x, params):
    h1 = jnp.maximum(x @ params["w1"].T + params["b1"].T, 0.0)
    h2 = jnp.maximum(h1 @ params["w2"].T + params["b2"].T, 0.0)
    return h2 @ params["w3"].T + params["b3"].T


if __name__ == "__main__":
    key = jax.random.PRNGKey(0)
    k_params, k_x = jax.random.split(key)

    params = init_params(k_params)

    # Small demo batch.
    batch = 8
    x = jax.random.normal(k_x, (batch, input_dim), jnp.float32)
    out = jax.block_until_ready(quaternion_nn_forward(x, params))
    ref = _reference(x, params)
    assert out.shape == (batch, output_dim)
    assert jnp.allclose(out, ref, atol=1e-5, rtol=1e-5)

    # Larger batch to exercise multiple grid steps + batch padding.
    big_batch = 640
    xb = jax.random.normal(k_x, (big_batch, input_dim), jnp.float32)
    outb = jax.block_until_ready(quaternion_nn_forward(xb, params))
    refb = _reference(xb, params)
    assert outb.shape == (big_batch, output_dim)
    assert jnp.allclose(outb, refb, atol=1e-5, rtol=1e-5)

    print("KERNEL_OK")
</pallas_src>

<mosaic_0001>
module attributes {stable_mosaic.version = 11 : i64} {
  func.func @mlp_kernel(%arg0: i32, %arg1: memref<4x128xf32, #tpu.memory_space<vmem>>, %arg2: memref<64x4xf32, #tpu.memory_space<vmem>>, %arg3: memref<64x1xf32, #tpu.memory_space<vmem>>, %arg4: memref<64x64xf32, #tpu.memory_space<vmem>>, %arg5: memref<64x1xf32, #tpu.memory_space<vmem>>, %arg6: memref<4x64xf32, #tpu.memory_space<vmem>>, %arg7: memref<4x1xf32, #tpu.memory_space<vmem>>, %arg8: memref<4x128xf32, #tpu.memory_space<vmem>>) attributes {dimension_semantics = [#tpu.dimension_semantics<parallel>], iteration_bounds = array<i64: 1>, scalar_prefetch = 0 : i64, scratch_operands = 0 : i64, tpu.core_type = #tpu.core_type<tc>, window_params = [{transform_indices = @transform_0, window_bounds = array<i64: 4, 128>}, {pipeline_mode = #tpu.pipeline_mode<synchronous>, transform_indices = @transform_1, window_bounds = array<i64: 64, 4>}, {pipeline_mode = #tpu.pipeline_mode<synchronous>, transform_indices = @transform_2, window_bounds = array<i64: 64, 1>}, {pipeline_mode = #tpu.pipeline_mode<synchronous>, transform_indices = @transform_3, window_bounds = array<i64: 64, 64>}, {pipeline_mode = #tpu.pipeline_mode<synchronous>, transform_indices = @transform_4, window_bounds = array<i64: 64, 1>}, {pipeline_mode = #tpu.pipeline_mode<synchronous>, transform_indices = @transform_5, window_bounds = array<i64: 4, 64>}, {pipeline_mode = #tpu.pipeline_mode<synchronous>, transform_indices = @transform_6, window_bounds = array<i64: 4, 1>}, {transform_indices = @transform_7, window_bounds = array<i64: 4, 128>}]} {
    %c0 = arith.constant 0 : index
    %c0_0 = arith.constant 0 : index
    %0 = vector.load %arg1[%c0, %c0_0] : memref<4x128xf32, #tpu.memory_space<vmem>>, vector<4x128xf32>
    %c0_1 = arith.constant 0 : index
    %c0_2 = arith.constant 0 : index
    %1 = vector.load %arg2[%c0_1, %c0_2] : memref<64x4xf32, #tpu.memory_space<vmem>>, vector<64x4xf32>
    %2 = vector.extract_strided_slice %1 {offsets = [0, 0], sizes = [64, 1], strides = [1, 1]} : vector<64x4xf32> to vector<64x1xf32>
    %3 = vector.extract_strided_slice %0 {offsets = [0, 0], sizes = [1, 128], strides = [1, 1]} : vector<4x128xf32> to vector<1x128xf32>
    %4 = vector.broadcast %2 : vector<64x1xf32> to vector<64x128xf32>
    %5 = vector.broadcast %3 : vector<1x128xf32> to vector<64x128xf32>
    %6 = arith.mulf %4, %5 : vector<64x128xf32>
    %7 = vector.extract_strided_slice %1 {offsets = [0, 1], sizes = [64, 1], strides = [1, 1]} : vector<64x4xf32> to vector<64x1xf32>
    %8 = vector.extract_strided_slice %0 {offsets = [1, 0], sizes = [1, 128], strides = [1, 1]} : vector<4x128xf32> to vector<1x128xf32>
    %9 = vector.broadcast %7 : vector<64x1xf32> to vector<64x128xf32>
    %10 = vector.broadcast %8 : vector<1x128xf32> to vector<64x128xf32>
    %11 = arith.mulf %9, %10 : vector<64x128xf32>
    %12 = arith.addf %6, %11 : vector<64x128xf32>
    %13 = vector.extract_strided_slice %1 {offsets = [0, 2], sizes = [64, 1], strides = [1, 1]} : vector<64x4xf32> to vector<64x1xf32>
    %14 = vector.extract_strided_slice %0 {offsets = [2, 0], sizes = [1, 128], strides = [1, 1]} : vector<4x128xf32> to vector<1x128xf32>
    %15 = vector.broadcast %13 : vector<64x1xf32> to vector<64x128xf32>
    %16 = vector.broadcast %14 : vector<1x128xf32> to vector<64x128xf32>
    %17 = arith.mulf %15, %16 : vector<64x128xf32>
    %18 = arith.addf %12, %17 : vector<64x128xf32>
    %19 = vector.extract_strided_slice %1 {offsets = [0, 3], sizes = [64, 1], strides = [1, 1]} : vector<64x4xf32> to vector<64x1xf32>
    %20 = vector.extract_strided_slice %0 {offsets = [3, 0], sizes = [1, 128], strides = [1, 1]} : vector<4x128xf32> to vector<1x128xf32>
    %21 = vector.broadcast %19 : vector<64x1xf32> to vector<64x128xf32>
    %22 = vector.broadcast %20 : vector<1x128xf32> to vector<64x128xf32>
    %23 = arith.mulf %21, %22 : vector<64x128xf32>
    %24 = arith.addf %18, %23 : vector<64x128xf32>
    %c0_3 = arith.constant 0 : index
    %c0_4 = arith.constant 0 : index
    %25 = vector.load %arg3[%c0_3, %c0_4] : memref<64x1xf32, #tpu.memory_space<vmem>>, vector<64x1xf32>
    %26 = vector.broadcast %25 : vector<64x1xf32> to vector<64x128xf32>
    %27 = arith.addf %24, %26 : vector<64x128xf32>
    %cst = arith.constant 0.000000e+00 : f32
    %28 = vector.broadcast %cst : f32 to vector<64x128xf32>
    %29 = arith.maximumf %27, %28 : vector<64x128xf32>
    %c0_5 = arith.constant 0 : index
    %c0_6 = arith.constant 0 : index
    %30 = vector.load %arg4[%c0_5, %c0_6] : memref<64x64xf32, #tpu.memory_space<vmem>>, vector<64x64xf32>
    %cst_7 = arith.constant dense<0.000000e+00> : vector<64x128xf32>
    %31 = tpu.matmul %30, %29, %cst_7 {dimension_numbers = #tpu.dot_dimension_numbers<[1], [0], [0], [1], [0, 0, 1, 1], [], []>} : vector<64x64xf32>, vector<64x128xf32>, vector<64x128xf32> -> vector<64x128xf32>
    %c0_8 = arith.constant 0 : index
    %c0_9 = arith.constant 0 : index
    %32 = vector.load %arg5[%c0_8, %c0_9] : memref<64x1xf32, #tpu.memory_space<vmem>>, vector<64x1xf32>
    %33 = vector.broadcast %32 : vector<64x1xf32> to vector<64x128xf32>
    %34 = arith.addf %31, %33 : vector<64x128xf32>
    %cst_10 = arith.constant 0.000000e+00 : f32
    %35 = vector.broadcast %cst_10 : f32 to vector<64x128xf32>
    %36 = arith.maximumf %34, %35 : vector<64x128xf32>
    %c0_11 = arith.constant 0 : index
    %c0_12 = arith.constant 0 : index
    %37 = vector.load %arg6[%c0_11, %c0_12] : memref<4x64xf32, #tpu.memory_space<vmem>>, vector<4x64xf32>
    %cst_13 = arith.constant dense<0.000000e+00> : vector<4x128xf32>
    %38 = tpu.matmul %37, %36, %cst_13 {dimension_numbers = #tpu.dot_dimension_numbers<[1], [0], [0], [1], [0, 0, 1, 1], [], []>} : vector<4x64xf32>, vector<64x128xf32>, vector<4x128xf32> -> vector<4x128xf32>
    %c0_14 = arith.constant 0 : index
    %c0_15 = arith.constant 0 : index
    %39 = vector.load %arg7[%c0_14, %c0_15] : memref<4x1xf32, #tpu.memory_space<vmem>>, vector<4x1xf32>
    %40 = vector.broadcast %39 : vector<4x1xf32> to vector<4x128xf32>
    %41 = arith.addf %38, %40 : vector<4x128xf32>
    %c0_16 = arith.constant 0 : index
    %c0_17 = arith.constant 0 : index
    %42 = vector.load %arg8[%c0_16, %c0_17] : memref<4x128xf32, #tpu.memory_space<vmem>>, vector<4x128xf32>
    tpu.vector_store %arg8[%c0_16, %c0_17], %41 {strides = array<i32>} : memref<4x128xf32, #tpu.memory_space<vmem>>, vector<4x128xf32>,
    return
  }
  func.func @transform_0(%arg0: i32) -> (i32, i32) {
    %c0_i32 = arith.constant 0 : i32
    %c0_i32_0 = arith.constant 0 : i32
    return %c0_i32, %arg0 : i32, i32
  }
  func.func @transform_1(%arg0: i32) -> (i32, i32) {
    %c0_i32 = arith.constant 0 : i32
    %c0_i32_0 = arith.constant 0 : i32
    %c0_i32_1 = arith.constant 0 : i32
    return %c0_i32, %c0_i32_0 : i32, i32
  }
  func.func @transform_2(%arg0: i32) -> (i32, i32) {
    %c0_i32 = arith.constant 0 : i32
    %c0_i32_0 = arith.constant 0 : i32
    %c0_i32_1 = arith.constant 0 : i32
    return %c0_i32, %c0_i32_0 : i32, i32
  }
  func.func @transform_3(%arg0: i32) -> (i32, i32) {
    %c0_i32 = arith.constant 0 : i32
    %c0_i32_0 = arith.constant 0 : i32
    %c0_i32_1 = arith.constant 0 : i32
    return %c0_i32, %c0_i32_0 : i32, i32
  }
  func.func @transform_4(%arg0: i32) -> (i32, i32) {
    %c0_i32 = arith.constant 0 : i32
    %c0_i32_0 = arith.constant 0 : i32
    %c0_i32_1 = arith.constant 0 : i32
    return %c0_i32, %c0_i32_0 : i32, i32
  }
  func.func @transform_5(%arg0: i32) -> (i32, i32) {
    %c0_i32 = arith.constant 0 : i32
    %c0_i32_0 = arith.constant 0 : i32
    %c0_i32_1 = arith.constant 0 : i32
    return %c0_i32, %c0_i32_0 : i32, i32
  }
  func.func @transform_6(%arg0: i32) -> (i32, i32) {
    %c0_i32 = arith.constant 0 : i32
    %c0_i32_0 = arith.constant 0 : i32
    %c0_i32_1 = arith.constant 0 : i32
    return %c0_i32, %c0_i32_0 : i32, i32
  }
  func.func @transform_7(%arg0: i32) -> (i32, i32) {
    %c0_i32 = arith.constant 0 : i32
    %c0_i32_0 = arith.constant 0 : i32
    return %c0_i32, %arg0 : i32, i32
  }
}

</mosaic_0001>

<bundles_post_ra>
// kernel: tpu_custom_call.1
= control target key start
LH: loop header
LB: loop body
LE: loop exit
PB: predicated region body
PF: predicated region fallthrough
CT: control target
= control target key end

     0   :  { %v560_v2 = vmov 2   ;;  %v561_v3 = vmov 0   ;;  %s797_s0 = inlined_call_operand.vmem [shape: f32[4,128], index: 0, kind: input, shape index: {}]   ;;  %s798_s1 = inlined_call_operand.vmem [shape: f32[64,4], index: 1, kind: input, shape index: {}]   ;;  %s799_s2 = inlined_call_operand.vmem [shape: f32[64,1], index: 2, kind: input, shape index: {}]   ;;  %s800_s3 = inlined_call_operand.vmem [shape: f32[64,64], index: 3, kind: input, shape index: {}]   ;;  %s801_s4 = inlined_call_operand.vmem [shape: f32[64,1], index: 4, kind: input, shape index: {}]   ;;  %s802_s5 = inlined_call_operand.vmem [shape: f32[4,64], index: 5, kind: input, shape index: {}]   ;;  %s803_s6 = inlined_call_operand.vmem [shape: f32[4,1], index: 6, kind: input, shape index: {}]   ;;  %s804_s7 = inlined_call_operand.hbm [shape: f32[4,128], index: 7, kind: output, shape index: {}]  }
   0x1   :  { %v35_v0 = vld [vmem:[%s798_s1 + $0x38] sm:$0xff]  ;;  %v34_v1 = vld [vmem:[%s798_s1 + $0x30] sm:$0xff]  ;;  %506 = vset.pattern.permute.xlu2 %v560_v2  ;;  %504 = vset.pattern.permute.xlu1 %v561_v3 }
   0x2   :  { %503 = vset.pattern.permute.xlu0 %v561_v3  ;;  %163 = vperm.xlu2 %506, %v35_v0  }
   0x3   :  { %12 = vsyncpa [#allocation3], 0  ;;  %73 = vperm.xlu0 %503, %v35_v0   ;;  %68 = vperm.xlu1 %504, %v34_v1   ;;  %v31_v4 = vld [vmem:[%s798_s1 + $0x18] sm:$0xff]  ;;  %v33_v5 = vld [vmem:[%s798_s1 + $0x28] sm:$0xff]  ;;  %v562_v6 = vmov 1   ;;  %v563_v10 = vmov 3  }
   0x4   :  { %v30_v7 = vld [vmem:[%s798_s1 + $0x10] sm:$0xff]  ;;  %v32_v8 = vld [vmem:[%s798_s1 + $0x20] sm:$0xff]  ;;  %v239_v11 = vld [vmem:[%s799_s2 + $0x38] sm:$0xff]  ;;  %vm352_vm0 = vcmask 523264   ;;  %s564_s18 = smov [#allocation2]   ;;  %s464_s21 = sshll.u32 %s804_s7, 4  ;;  %s465_s21 = int_to_ptr.hbm [resolvable:$true] %s464_s21 }
   0x5   :  { %v28_v9 = vld [vmem:[%s798_s1] sm:$0xff]  ;;  %v29_v12 = vld [vmem:[%s798_s1 + $0x8] sm:$0xff]  ;;  %v238_v13 = vld [vmem:[%s799_s2 + $0x30] sm:$0xff] }
   0x6   :  { %v232_v14 = vld [vmem:[%s799_s2] sm:$0xff]  ;;  %v237_v15 = vld [vmem:[%s799_s2 + $0x28] sm:$0xff]  ;;  %v307_v16 = vld [vmem:[%s801_s4 + $0x18] sm:$0xff] }
   0x7   :  { %v304_v17 = vld [vmem:[%s801_s4] sm:$0xff]  ;;  %v235_v21 = vld [vmem:[%s799_s2 + $0x18] sm:$0xff]  ;;  %v234_v25 = vld [vmem:[%s799_s2 + $0x10] sm:$0xff] }
   0x8   :  { %v236_v19 = vld [vmem:[%s799_s2 + $0x20] sm:$0xff]  ;;  %v233_v28 = vld [vmem:[%s799_s2 + $0x8] sm:$0xff]  ;;  %v311_v29 = vld [vmem:[%s801_s4 + $0x38] sm:$0xff]  ;;  %s462_s2 = sshll.u32 %s564_s18, 4  ;;  %s463_s2 = int_to_ptr.vmem [resolvable:$true] %s462_s2 }
   0x9   :  { %v310_v33 = vld [vmem:[%s801_s4 + $0x30] sm:$0xff]  ;;  %v27_v34 = vld [vmem:[%s797_s0] sm:$0xf]  ;;  %v309_v35 = vld [vmem:[%s801_s4 + $0x28] sm:$0xff] }
   0xa   :  { %507 = vset.pattern.permute.xlu2 %v561_v3  ;;  %v697_v36 = vperm.slane %v27_v34, 1  ;;  %v699_v37 = vperm.slane %v27_v34, 0  ;;  %v308_v41 = vld [vmem:[%s801_s4 + $0x20] sm:$0xff]  ;;  %v306_v45 = vld [vmem:[%s801_s4 + $0x10] sm:$0xff]  ;;  %v305_v48 = vld [vmem:[%s801_s4 + $0x8] sm:$0xff]  ;;  %v718_v52 = vperm.slane %v27_v34, 2 }
   0xb   :  { %505 = vset.pattern.permute.xlu1 %v562_v6  ;;  %53 = vperm.xlu0 %503, %v31_v4   ;;  %v427_v53 = vld [vmem:[%s803_s6] sm:$0xf]  ;;  %v724_v56 = vperm.slane %v27_v34, 3 }
   0xc   :  { %110 = vperm.xlu1 %505, %v34_v1   ;;  %63 = vperm.xlu2 %507, %v33_v5  }
  0x13   :  { %48 = vperm.xlu0 %503, %v30_v7  }
  0x14   :  { %106 = vperm.xlu1 %505, %v33_v5   ;;  %508 = vset.pattern.permute.xlu2 %v560_v2 }
  0x15   :  { %159 = vperm.xlu2 %508, %v34_v1  }
  0x1b   :  { %517 = vset.pattern.permute.xlu0 %v562_v6 }
  0x1c   :  { %509 = vset.pattern.permute.xlu1 %v561_v3  ;;  %114 = vperm.xlu0 %517, %v35_v0  }
  0x1d   :  { %510 = vset.pattern.permute.xlu2 %v562_v6  ;;  %58 = vperm.xlu1 %509, %v32_v8  }
  0x1e   :  { %102 = vperm.xlu2 %510, %v32_v8  }
  0x24   :  { %86 = vperm.xlu0 %517, %v28_v9  }
  0x25   :  { %511 = vset.pattern.permute.xlu1 %v560_v2 }
  0x26   :  { %512 = vset.pattern.permute.xlu2 %v563_v10  ;;  %155 = vperm.xlu1 %511, %v33_v5  }
  0x27   :  { %208 = vperm.xlu2 %512, %v34_v1  }
  0x2c   :  { %526 = vset.pattern.permute.xlu0 %v563_v10 }
  0x2d   :  { %212 = vperm.xlu0 %526, %v35_v0  }
  0x2e   :  { %513 = vset.pattern.permute.xlu1 %v562_v6 }
  0x2f   :  { %514 = vset.pattern.permute.xlu2 %v560_v2  ;;  %98 = vperm.xlu1 %513, %v31_v4  }
  0x30   :  { %151 = vperm.xlu2 %514, %v32_v8  }
  0x35   :  { %200 = vperm.xlu0 %526, %v32_v8  }
  0x37   :  { %515 = vset.pattern.permute.xlu1 %v563_v10 }
  0x38   :  { %516 = vset.pattern.permute.xlu2 %v561_v3  ;;  %204 = vperm.xlu1 %515, %v33_v5  }
  0x39   :  { %277 = vperm.xlu2 %516, %v239_v11  }
  0x3d   :  { %196 = vperm.xlu0 %526, %v31_v4  }
  0x40   :  { %518 = vset.pattern.permute.xlu1 %v562_v6 }
  0x41   :  { %519 = vset.pattern.permute.xlu2 %v560_v2  ;;  %94 = vperm.xlu1 %518, %v30_v7  }
  0x42   :  { %147 = vperm.xlu2 %519, %v31_v4  }
  0x45   :  { %188 = vperm.xlu0 %526, %v29_v12  }
  0x49   :  { %520 = vset.pattern.permute.xlu1 %v561_v3 }
  0x4a   :  { %521 = vset.pattern.permute.xlu2 %v561_v3  ;;  %272 = vperm.xlu1 %520, %v238_v13  }
  0x4b   :  { %43 = vperm.xlu2 %521, %v29_v12  }
  0x4d   :  { %533 = vset.pattern.permute.xlu0 %v561_v3 }
  0x4e   :  { %242 = vperm.xlu0 %533, %v232_v14  }
  0x52   :  { %522 = vset.pattern.permute.xlu1 %v562_v6 }
  0x53   :  { %90 = vperm.xlu1 %522, %v29_v12   ;;  %523 = vset.pattern.permute.xlu2 %v560_v2 }
  0x54   :  { %143 = vperm.xlu2 %523, %v30_v7  }
  0x56   :  { %329 = vperm.xlu0 %533, %v307_v16  }
  0x5b   :  { %524 = vset.pattern.permute.xlu1 %v561_v3 }
  0x5c   :  { %267 = vperm.xlu1 %524, %v237_v15   ;;  %525 = vset.pattern.permute.xlu2 %v561_v3  ;;  %v164_v18 = vpop.permute.xlu2 %163 }
  0x5d   :  { %38 = vperm.xlu2 %525, %v28_v9   ;;  %v174_v55 = vmul.f32 %v718_v52, %v164_v18 }
  0x5e   :  { %314 = vperm.xlu0 %533, %v304_v17  }
  0x64   :  { %527 = vset.pattern.permute.xlu1 %v560_v2 }
  0x65   :  { %139 = vperm.xlu1 %527, %v29_v12   ;;  %528 = vset.pattern.permute.xlu2 %v563_v10 }
  0x66   :  { %192 = vperm.xlu2 %528, %v30_v7   ;;  %v669_v20 = vpop.permute.xlu2 %63 }
  0x67   :  { %v82_v18 = vmul.f32 %v699_v37, %v669_v20 }
  0x6d   :  { %529 = vset.pattern.permute.xlu1 %v561_v3 }
  0x6e   :  { %262 = vperm.xlu1 %529, %v236_v19   ;;  %530 = vset.pattern.permute.xlu2 %v560_v2 }
  0x6f   :  { %135 = vperm.xlu2 %530, %v28_v9   ;;  %v160_v24 = vpop.permute.xlu2 %159 }
  0x70   :  { %v173_v5 = vmul.f32 %v718_v52, %v160_v24 }
  0x75   :  { %v69_v22 = vpop.permute.xlu1 %68  ;;  %v74_v23 = vpop.permute.xlu0 %73 }
  0x76   :  { %257 = vperm.xlu1 %529, %v235_v21   ;;  %v84_v49 = vmul.f32 %v699_v37, %v74_v23  ;;  %v83_v4 = vmul.f32 %v699_v37, %v69_v22 }
  0x77   :  { %531 = vset.pattern.permute.xlu2 %v563_v10 }
  0x78   :  { %184 = vperm.xlu2 %531, %v28_v9   ;;  %v103_v30 = vpop.permute.xlu2 %102 }
  0x79   :  { %v122_v38 = vmul.f32 %v697_v36, %v103_v30 }
  0x7d   :  { %v677_v26 = vpop.permute.xlu0 %53 }
  0x7e   :  { %v111_v27 = vpop.permute.xlu1 %110  ;;  %252 = vperm.xlu1 %529, %v234_v25  }
  0x80   :  { %532 = vset.pattern.permute.xlu2 %v561_v3  ;;  %v124_v3 = vmul.f32 %v697_v36, %v111_v27 }
  0x81   :  { %247 = vperm.xlu2 %532, %v233_v28   ;;  %v209_v39 = vpop.permute.xlu2 %208 }
  0x82   :  { %v132_v6 = vadd.f32 %v124_v3, %v83_v4  ;;  %v222_v9 = vmul.f32 %v724_v56, %v209_v39 }
  0x84   :  { %v181_v10 = vadd.f32 %v173_v5, %v132_v6 }
  0x85   :  { %v686_v31 = vpop.permute.xlu0 %48 }
  0x86   :  { %v107_v32 = vpop.permute.xlu1 %106  ;;  %349 = vperm.xlu1 %529, %v311_v29   ;;  %v230_v11 = vadd.f32 %v222_v9, %v181_v10 }
  0x87   :  { %v123_v16 = vmul.f32 %v697_v36, %v107_v32 }
  0x89   :  { %344 = vperm.xlu2 %532, %v310_v33   ;;  %v131_v22 = vadd.f32 %v123_v16, %v82_v18  ;;  %v296_v18 = vld [vmem:[%s800_s3] sm:$0xff] }
  0x8a   :  { %v152_v46 = vpop.permute.xlu2 %151 }
  0x8b   :  { %v171_v34 = vmul.f32 %v718_v52, %v152_v46 }
  0x8e   :  { %v115_v40 = vpop.permute.xlu0 %114  ;;  %339 = vperm.xlu1 %529, %v309_v35  }
  0x8f   :  { %v59_v42 = vpop.permute.xlu1 %58  ;;  %v125_v50 = vmul.f32 %v697_v36, %v115_v40 }
  0x90   :  { %v81_v43 = vmul.f32 %v699_v37, %v59_v42 }
  0x91   :  { %334 = vperm.xlu2 %532, %v308_v41   ;;  %v133_v54 = vadd.f32 %v125_v50, %v84_v49 }
  0x92   :  { %v706_v44 = vadd.f32 %v122_v38, %v81_v43  ;;  %v80_v38 = vmul.f32 %v699_v37, %v677_v26 }
  0x93   :  { %v278_v58 = vpop.permute.xlu2 %277  ;;  %v182_v59 = vadd.f32 %v174_v55, %v133_v54 }
  0x94   :  { %v179_v39 = vadd.f32 %v171_v34, %v706_v44 }
  0x96   :  { %324 = vperm.xlu1 %529, %v306_v45   ;;  %v711_v47 = vpop.permute.xlu0 %86 }
  0x98   :  { %v156_v51 = vpop.permute.xlu1 %155 }
  0x99   :  { %319 = vperm.xlu2 %532, %v305_v48   ;;  %v172_v19 = vmul.f32 %v718_v52, %v156_v51 }
  0x9b   :  { %v180_v24 = vadd.f32 %v172_v19, %v131_v22  ;;  %v298_v19 = vld [vmem:[%s800_s3 + $0x10] sm:$0xff]  ;;  %v297_v22 = vld [vmem:[%s800_s3 + $0x8] sm:$0xff] }
  0x9c   :  { %v148_v1 = vpop.permute.xlu2 %147 }
  0x9d   :  { %v170_v45 = vmul.f32 %v718_v52, %v148_v1 }
  0x9e   :  { %430 = vperm.xlu1 %529, %v427_v53  }
  0x9f   :  { %v213_v57 = vpop.permute.xlu0 %212 }
  0xa0   :  { %v223_v60 = vmul.f32 %v724_v56, %v213_v57  ;;  %v79_v57 = vmul.f32 %v699_v37, %v686_v31 }
  0xa1   :  { %v99_v61 = vpop.permute.xlu1 %98 }
  0xa2   :  { %v231_v62 = vadd.f32 %v223_v60, %v182_v59  ;;  %v121_v40 = vmul.f32 %v697_v36, %v99_v61  ;;  %v118_v59 = vmul.f32 %v697_v36, %v711_v47 }
  0xa4   :  { %v287_v63 = vadd.f32 %v278_v58, %v231_v62  ;;  %v129_v48 = vadd.f32 %v121_v40, %v80_v38 }
  0xa5   :  { %v44_v8 = vpop.permute.xlu2 %43 }
  0xa6   :  { %v295_v0 = vmax.f32 %v287_v63, 0.0  ;;  %v78_v53 = vmul.f32 %v699_v37, %v44_v8  ;;  %v178_v55 = vadd.f32 %v170_v45, %v129_v48 }
  0xa7   :  { %v201_v33 = vpop.permute.xlu0 %200 }
  0xa8   :  { %385 = vmatpush.msra.mxu0 %v295_v0  ;;  %482 = vmatpush.msra.mxu2 %v295_v0  ;;  %v220_v20 = vmul.f32 %v724_v56, %v201_v33 }
  0xa9   :  { %483 = vmatpush.msra.mxu3 %v295_v0 }
  0xaa   :  { %v205_v2 = vpop.permute.xlu1 %204  ;;  %v228_v42 = vadd.f32 %v220_v20, %v179_v39 }
  0xab   :  { %v221_v23 = vmul.f32 %v724_v56, %v205_v2 }
  0xad   :  { %v229_v25 = vadd.f32 %v221_v23, %v180_v24  ;;  %v299_v23 = vld [vmem:[%s800_s3 + $0x18] sm:$0xff]  ;;  %v302_v24 = vld [vmem:[%s800_s3 + $0x30] sm:$0xff] }
  0xae   :  { %v144_v14 = vpop.permute.xlu2 %143 }
  0xaf   :  { %v197_v41 = vpop.permute.xlu0 %196  ;;  %v169_v63 = vmul.f32 %v718_v52, %v144_v14 }
  0xb0   :  { %v219_v50 = vmul.f32 %v724_v56, %v197_v41 }
  0xb2   :  { %v227_v62 = vadd.f32 %v219_v50, %v178_v55 }
  0xb3   :  { %v95_v7 = vpop.permute.xlu1 %94 }
  0xb4   :  { %v120_v26 = vmul.f32 %v697_v36, %v95_v7 }
  0xb6   :  { %v128_v1 = vadd.f32 %v120_v26, %v79_v57 }
  0xb7   :  { %v39_v21 = vpop.permute.xlu2 %38  ;;  %v189_v54 = vpop.permute.xlu0 %188 }
  0xb8   :  { %v77_v60 = vmul.f32 %v699_v37, %v39_v21  ;;  %v217_v5 = vmul.f32 %v724_v56, %v189_v54  ;;  %v177_v8 = vadd.f32 %v169_v63, %v128_v1  ;;  %v301_v21 = vld [vmem:[%s800_s3 + $0x28] sm:$0xff] }
  0xba   :  { %v126_v31 = vadd.f32 %v118_v59, %v77_v60 }
  0xbc   :  { %v273_v12 = vpop.permute.xlu1 %272 }
  0xbd   :  { %v286_v13 = vadd.f32 %v273_v12, %v230_v11 }
  0xbf   :  { %v294_v15 = vmax.f32 %v286_v13, 0.0 }
  0xc0   :  { %v193_v30 = vpop.permute.xlu2 %192  ;;  %v243_v9 = vpop.permute.xlu0 %242 }
  0xc1   :  { %386 = vmatpush.msra.mxu0 %v294_v15  ;;  %484 = vmatpush.msra.mxu2 %v294_v15  ;;  %v218_v6 = vmul.f32 %v724_v56, %v193_v30 }
  0xc2   :  { %485 = vmatpush.msra.mxu3 %v294_v15 }
  0xc3   :  { %v226_v11 = vadd.f32 %v218_v6, %v177_v8 }
  0xc5   :  { %v91_v17 = vpop.permute.xlu1 %90 }
  0xc6   :  { %v119_v46 = vmul.f32 %v697_v36, %v91_v17 }
  0xc8   :  { %v127_v61 = vadd.f32 %v119_v46, %v78_v53 }
  0xc9   :  { %v136_v35 = vpop.permute.xlu2 %135 }
  0xca   :  { %v167_v2 = vmul.f32 %v718_v52, %v136_v35 }
  0xcc   :  { %v175_v47 = vadd.f32 %v167_v2, %v126_v31 }
  0xce   :  { %v268_v27 = vpop.permute.xlu1 %267 }
  0xcf   :  { %v285_v28 = vadd.f32 %v268_v27, %v229_v25  ;;  %v300_v25 = vld [vmem:[%s800_s3 + $0x20] sm:$0xff]  ;;  %v303_v27 = vld [vmem:[%s800_s3 + $0x38] sm:$0xff] }
  0xd1   :  { %v293_v29 = vmax.f32 %v285_v28, 0.0 }
  0xd2   :  { %v185_v58 = vpop.permute.xlu2 %184 }
  0xd3   :  { %387 = vmatpush.msra.mxu0 %v293_v29  ;;  %486 = vmatpush.msra.mxu2 %v293_v29  ;;  %v216_v7 = vmul.f32 %v724_v56, %v185_v58 }
  0xd4   :  { %487 = vmatpush.msra.mxu3 %v293_v29 }
  0xd5   :  { %v224_v10 = vadd.f32 %v216_v7, %v175_v47 }
  0xd7   :  { %v140_v32 = vpop.permute.xlu1 %139  ;;  %v280_v15 = vadd.f32 %v243_v9, %v224_v10 }
  0xd8   :  { %v168_v44 = vmul.f32 %v718_v52, %v140_v32 }
  0xd9   :  { %v288_v56 = vmax.f32 %v280_v15, 0.0 }
  0xda   :  { %v176_v3 = vadd.f32 %v168_v44, %v127_v61 }
  0xdb   :  { %v248_v52 = vpop.permute.xlu2 %247 }
  0xdc   :  { %v225_v37 = vadd.f32 %v217_v5, %v176_v3 }
  0xde   :  { %v281_v13 = vadd.f32 %v248_v52, %v225_v37 }
  0xe0   :  { %v263_v43 = vpop.permute.xlu1 %262  ;;  %v289_v17 = vmax.f32 %v281_v13, 0.0 }
  0xe1   :  { %v284_v49 = vadd.f32 %v263_v43, %v228_v42  ;;  %v330_v42 = vpop.permute.xlu0 %329 }
  0xe3   :  { %v292_v51 = vmax.f32 %v284_v49, 0.0  ;;  %v345_v33 = vpop.permute.xlu2 %344 }
  0xe5   :  { %388 = vmatpush.msra.mxu0 %v292_v51  ;;  %488 = vmatpush.msra.mxu2 %v292_v51 }
  0xe6   :  { %489 = vmatpush.msra.mxu3 %v292_v51 }
  0xe8   :  { %v258_v0 = vpop.permute.xlu1 %257 }
  0xe9   :  { %v283_v4 = vadd.f32 %v258_v0, %v227_v62  ;;  %v315_v59 = vpop.permute.xlu0 %314  ;;  %v426_v0 = vld [vmem:[%s802_s5] sm:$0xf] }
  0xeb   :  { %v291_v36 = vmax.f32 %v283_v4, 0.0  ;;  %v335_v38 = vpop.permute.xlu2 %334 }
  0xed   :  { %389 = vmatpush.msra.mxu0 %v291_v36  ;;  %490 = vmatpush.msra.mxu2 %v291_v36 }
  0xee   :  { %491 = vmatpush.msra.mxu3 %v291_v36 }
  0xf0   :  { %v253_v12 = vpop.permute.xlu1 %252 }
  0xf1   :  { %v282_v14 = vadd.f32 %v253_v12, %v226_v11 }
  0xf3   :  { %v290_v16 = vmax.f32 %v282_v14, 0.0  ;;  %v320_v55 = vpop.permute.xlu2 %319 }
  0xf5   :  { %390 = vmatpush.msra.mxu0 %v290_v16  ;;  %492 = vmatpush.msra.mxu2 %v290_v16 }
  0xf6   :  { %493 = vmatpush.msra.mxu3 %v290_v16 }
  0xf7   :  { %391 = vmatpush.msra.mxu0 %v289_v17  ;;  %494 = vmatpush.msra.mxu2 %v289_v17 }
  0xf8   :  { %495 = vmatpush.msra.mxu3 %v289_v17  ;;  %v350_v30 = vpop.permute.xlu1 %349 }
  0xf9   :  { %392 = vmatpush.msra.mxu0 %v288_v56  ;;  %496 = vmatpush.msra.mxu2 %v288_v56 }
  0xfa   :  { %497 = vmatpush.msra.mxu3 %v288_v56  ;;  %473 = vmatmul.msk.f32.vlgmr.msra.gmra.mxu0 %vm352_vm0, %v296_v18 }
  0xfb   :  { %475 = vmatmul.msk.f32.vlgmr.msra.gmra.mxu2 %vm352_vm0, %v298_v19  ;;  %478 = vmatmul.msk.f32.vlgmr.msra.gmra.mxu3 %vm352_vm0, %v301_v21 }
 0x100   :  { %v340_v20 = vpop.permute.xlu1 %339 }
 0x102   :  { %474 = vmatmul.msk.f32.gmra.mxu0 %vm352_vm0, %v297_v22 }
 0x103   :  { %476 = vmatmul.msk.f32.gmra.mxu2 %vm352_vm0, %v299_v23  ;;  %479 = vmatmul.msk.f32.gmra.mxu3 %vm352_vm0, %v302_v24 }
 0x108   :  { %v325_v53 = vpop.permute.xlu1 %324 }
 0x10b   :  { %477 = vmatmul.msk.f32.gmra.mxu2 %vm352_vm0, %v300_v25  ;;  %480 = vmatmul.msk.f32.gmra.mxu3 %vm352_vm0, %v303_v27 }
 0x110   :  { %v431_v1 = vpop.permute.xlu1 %430 }
 0x177   :  { %v394_v35 = vpop.f32.mrf.mxu0 }
 0x178   :  { %v395_v60 = vadd.f32 %v394_v35, %v315_v59 }
 0x17a   :  { %v418_v63 = vmax.f32 %v395_v60, 0.0 }
 0x17e   :  { %v400_v28 = vpop.f32.mrf.mxu2  ;;  %v409_v29 = vpop.f32.mrf.mxu3 }
 0x17f   :  { %v410_v45 = vadd.f32 %v409_v29, %v340_v20  ;;  %v397_v26 = vpop.f32.mrf.mxu0  ;;  %v401_v54 = vadd.f32 %v400_v28, %v325_v53 }
 0x180   :  { %v398_v57 = vadd.f32 %v397_v26, %v320_v55 }
 0x181   :  { %v423_v46 = vmax.f32 %v410_v45, 0.0  ;;  %v420_v61 = vmax.f32 %v401_v54, 0.0 }
 0x182   :  { %v419_v62 = vmax.f32 %v398_v57, 0.0 }
 0x186   :  { %v403_v32 = vpop.f32.mrf.mxu2  ;;  %v412_v34 = vpop.f32.mrf.mxu3 }
 0x187   :  { %v413_v40 = vadd.f32 %v412_v34, %v345_v33  ;;  %v404_v51 = vadd.f32 %v403_v32, %v330_v42 }
 0x189   :  { %v424_v49 = vmax.f32 %v413_v40, 0.0  ;;  %v421_v58 = vmax.f32 %v404_v51, 0.0 }
 0x18e   :  { %v415_v39 = vpop.f32.mrf.mxu3  ;;  %v406_v43 = vpop.f32.mrf.mxu2 }
 0x18f   :  { %v416_v41 = vadd.f32 %v415_v39, %v350_v30  ;;  %v407_v50 = vadd.f32 %v406_v43, %v335_v38 }
 0x191   :  { %v425_v48 = vmax.f32 %v416_v41, 0.0  ;;  %v422_v44 = vmax.f32 %v407_v50, 0.0 }
 0x193   :  { %444 = vmatpush.msra.mxu1 %v425_v48 }
 0x195   :  { %445 = vmatpush.msra.mxu1 %v424_v49 }
 0x197   :  { %446 = vmatpush.msra.mxu1 %v423_v46 }
 0x199   :  { %447 = vmatpush.msra.mxu1 %v422_v44 }
 0x19b   :  { %448 = vmatpush.msra.mxu1 %v421_v58 }
 0x19d   :  { %449 = vmatpush.msra.mxu1 %v420_v61 }
 0x19f   :  { %450 = vmatpush.msra.mxu1 %v419_v62 }
 0x1a1   :  { %451 = vmatpush.msra.mxu1 %v418_v63 }
 0x1a2   :  { %481 = vmatmul.msk.f32.vlgmr.msra.gmra.mxu1 %vm352_vm0, %v426_v0 }
 0x21f   :  { %v453_v2 = vpop.f32.mrf.mxu1 }
 0x220   :  { %v454_v3 = vadd.f32 %v453_v2, %v431_v1 }
 0x222   :  { %456 = vst [vmem:[#allocation2] sm:$0xf] %v454_v3 }
 0x223   :  { %467 = dma.vmem_to_hbm [thread:$0]  %s463_s2, 64, %s465_s21, [#allocation3]  }
 0x224   :  { %558 = dma.done.wait [#allocation3], 64  }
 0x225   :  { %559 = vsyncadd [#allocation3], 4294967232 }
 0x226   :  { %472 = vsyncpa [#allocation3], 1 }

</bundles_post_ra>
